<compile_context>
chip_gen: v6e
topology: v6e:2x2x1
jax: 0.10.0
libtpu: 0.0.40
codegen_flags: <defaults>
</compile_context>

<pallas_src>
import functools

import jax
import jax.numpy as jnp
from jax.experimental import pallas as pl
from jax.experimental.pallas import tpu as pltpu

NEG_SLOPE = 0.01  # nn.LeakyReLU default negative_slope


def _leaky_relu(x):
    return jnp.where(x >= 0, x, NEG_SLOPE * x)


def _round_up(n, m):
    return (n + m - 1) // m * m


def _groupcode_kernel(x_ref, w1_ref, b1_ref, w2_ref, b2_ref, w3_ref, b3_ref,
                      o_ref, *, out_is_scalar):
    """One batch tile.  x_ref: (TB, in) f32; weights resident; o_ref: (out, TB)."""
    # bf16 operands for the MXU; transpose x so batch maps to the lane axis.
    x_bf = x_ref[...].astype(jnp.bfloat16)                      # (TB, in)

    # h1 = W1 @ x^T  -> (H1, TB), f32 accumulation on the MXU.
    h1 = jnp.dot(w1_ref[...], x_bf.T,
                 preferred_element_type=jnp.float32) + b1_ref[...]
    h1 = _leaky_relu(h1)                                        # f32 epilogue

    # h2 = W2 @ h1 -> (H2, TB)
    h2 = jnp.dot(w2_ref[...], h1.astype(jnp.bfloat16),
                 preferred_element_type=jnp.float32) + b2_ref[...]
    h2 = _leaky_relu(h2)

    if out_is_scalar:
        # output_size == 1: keep the width-1 matmul off the MXU.  VPU multiply
        # + cross-sublane reduce yields a lane-dense (1, TB) row directly.
        h3 = jnp.sum(w3_ref[...] * h2, axis=0, keepdims=True) + b3_ref[...]
    else:
        h3 = jnp.dot(w3_ref[...], h2.astype(jnp.bfloat16),
                     preferred_element_type=jnp.float32) + b3_ref[...]

    o_ref[...] = ((jnp.sin(h3) + 1.0) * 0.5).astype(o_ref.dtype)


def groupcode_forward(x, params, *, block_rows=512):
    """x: (B, input_size) f32; params in PyTorch layout.  Returns (B, output_size) f32."""
    w1, b1 = params["w1"], params["b1"]          # (H1, in), (H1,)
    w2, b2 = params["w2"], params["b2"]          # (H2, H1), (H2,)
    w3, b3 = params["w3"], params["b3"]          # (out, H2), (out,)

    B, in_size = x.shape
    h1_size = w1.shape[0]
    h2_size = w2.shape[0]
    out_size = w3.shape[0]
    out_is_scalar = out_size == 1

    # Batch tile: large enough to amortize the ~0.35 us per-grid-step overhead,
    # small enough to stay far below the scoped VMEM limit on every generation.
    if B <= block_rows:
        tb = _round_up(max(B, 1), 8)             # single tile
    else:
        tb = _round_up(block_rows, 128)          # lane-dense output blocks
    num_tiles = pl.cdiv(B, tb)
    padded_b = num_tiles * tb

    # Kernel-side parameter layout: bf16 MXU operands, f32 bias columns.
    w1_k = w1.astype(jnp.bfloat16)                               # (H1, in)
    w2_k = w2.astype(jnp.bfloat16)                               # (H2, H1)
    b1_k = b1.reshape(h1_size, 1).astype(jnp.float32)
    b2_k = b2.reshape(h2_size, 1).astype(jnp.float32)
    b3_k = b3.reshape(out_size, 1).astype(jnp.float32)
    if out_is_scalar:
        w3_k = w3.reshape(h2_size, 1).astype(jnp.float32)        # column, VPU path
    else:
        w3_k = w3.astype(jnp.bfloat16)                           # (out, H2)

    def resident(shape):
        # Weights / biases: same block every grid step -> stay resident in VMEM.
        return pl.BlockSpec(shape, lambda i: (0, 0))

    flops = 2 * B * (in_size * h1_size + h1_size * h2_size + h2_size * out_size)
    bytes_accessed = (
        x.size * x.dtype.itemsize
        + w1_k.size * 2 + w2_k.size * 2 + w3_k.size * w3_k.dtype.itemsize
        + (h1_size + h2_size + out_size) * 4
        + padded_b * out_size * 4
    )

    out_t = pl.pallas_call(
        functools.partial(_groupcode_kernel, out_is_scalar=out_is_scalar),
        out_shape=jax.ShapeDtypeStruct((out_size, padded_b), jnp.float32),
        grid=(num_tiles,),
        in_specs=[
            pl.BlockSpec((tb, in_size), lambda i: (i, 0)),       # x streams in tiles
            resident((h1_size, in_size)),
            resident((h1_size, 1)),
            resident((h2_size, h1_size)),
            resident((h2_size, 1)),
            resident(w3_k.shape),
            resident((out_size, 1)),
        ],
        out_specs=pl.BlockSpec((out_size, tb), lambda i: (0, i)),  # lane-dense rows
        compiler_params=pltpu.CompilerParams(
            dimension_semantics=("parallel",),                    # megacore on v7x
        ),
        cost_estimate=pl.CostEstimate(
            flops=flops,
            transcendentals=B * out_size,
            bytes_accessed=bytes_accessed,
        ),
    )(x, w1_k, b1_k, w2_k, b2_k, w3_k, b3_k)

    # (out, padded_B) -> (B, out): wrapper-side layout plumbing only.
    return out_t[:, :B].T


def init_params(key, input_size, hidden_size1, hidden_size2, output_size=1):
    """Deterministic init mimicking nn.Linear's U(-1/sqrt(fan_in), 1/sqrt(fan_in))."""
    ks = jax.random.split(key, 6)

    def lin(kw, kb, fan_in, fan_out):
        bound = 1.0 / jnp.sqrt(jnp.float32(fan_in))
        w = jax.random.uniform(kw, (fan_out, fan_in), jnp.float32, -bound, bound)
        b = jax.random.uniform(kb, (fan_out,), jnp.float32, -bound, bound)
        return w, b

    w1, b1 = lin(ks[0], ks[1], input_size, hidden_size1)
    w2, b2 = lin(ks[2], ks[3], hidden_size1, hidden_size2)
    w3, b3 = lin(ks[4], ks[5], hidden_size2, output_size)
    return {"w1": w1, "b1": b1, "w2": w2, "b2": b2, "w3": w3, "b3": b3}


def reference_forward(x, p):
    """Pure-JAX reference mirroring the kernel numerics (bf16 MXU operands, f32 math)."""
    def bf(a):
        return a.astype(jnp.bfloat16).astype(jnp.float32)

    h1 = _leaky_relu(bf(x) @ bf(p["w1"]).T + p["b1"])
    h2 = _leaky_relu(bf(h1) @ bf(p["w2"]).T + p["b2"])
    if p["w3"].shape[0] == 1:
        h3 = h2 @ p["w3"].T + p["b3"]            # kernel keeps the final layer in f32
    else:
        h3 = bf(h2) @ bf(p["w3"]).T + p["b3"]
    return (jnp.sin(h3) + 1.0) * 0.5


if __name__ == "__main__":
    key = jax.random.PRNGKey(0)
    k_x, k_p = jax.random.split(key)

    batch = 1024
    input_size, hidden_size1, hidden_size2, output_size = 32, 64, 32, 1

    x = jax.random.normal(k_x, (batch, input_size), jnp.float32)
    params = init_params(k_p, input_size, hidden_size1, hidden_size2, output_size)

    # block_rows=256 -> 4 grid steps, exercising the pipelined / parallel grid.
    out = groupcode_forward(x, params, block_rows=256)
    out = jax.block_until_ready(out)

    ref = reference_forward(x, params)
    assert out.shape == (batch, output_size)
    assert jnp.allclose(out, ref, atol=1e-3, rtol=1e-3), float(jnp.max(jnp.abs(out - ref)))

    print("KERNEL_OK")
</pallas_src>

<mosaic_0001>
module attributes {stable_mosaic.version = 11 : i64} {
  func.func @_groupcode_kernel(%arg0: i32, %arg1: memref<256x32xf32, #tpu.memory_space<vmem>>, %arg2: memref<64x32xbf16, #tpu.memory_space<vmem>>, %arg3: memref<64x1xf32, #tpu.memory_space<vmem>>, %arg4: memref<32x64xbf16, #tpu.memory_space<vmem>>, %arg5: memref<32x1xf32, #tpu.memory_space<vmem>>, %arg6: memref<32x1xf32, #tpu.memory_space<vmem>>, %arg7: memref<1x1xf32, #tpu.memory_space<vmem>>, %arg8: memref<1x256xf32, #tpu.memory_space<vmem>>) attributes {dimension_semantics = [#tpu.dimension_semantics<parallel>], iteration_bounds = array<i64: 4>, scalar_prefetch = 0 : i64, scratch_operands = 0 : i64, tpu.core_type = #tpu.core_type<tc>, window_params = [{transform_indices = @transform_0, window_bounds = array<i64: 256, 32>}, {pipeline_mode = #tpu.pipeline_mode<synchronous>, transform_indices = @transform_1, window_bounds = array<i64: 64, 32>}, {pipeline_mode = #tpu.pipeline_mode<synchronous>, transform_indices = @transform_2, window_bounds = array<i64: 64, 1>}, {pipeline_mode = #tpu.pipeline_mode<synchronous>, transform_indices = @transform_3, window_bounds = array<i64: 32, 64>}, {pipeline_mode = #tpu.pipeline_mode<synchronous>, transform_indices = @transform_4, window_bounds = array<i64: 32, 1>}, {pipeline_mode = #tpu.pipeline_mode<synchronous>, transform_indices = @transform_5, window_bounds = array<i64: 32, 1>}, {pipeline_mode = #tpu.pipeline_mode<synchronous>, transform_indices = @transform_6, window_bounds = array<i64: 1, 1>}, {transform_indices = @transform_7, window_bounds = array<i64: 1, 256>}]} {
    %c0 = arith.constant 0 : index
    %c0_0 = arith.constant 0 : index
    %0 = vector.load %arg1[%c0, %c0_0] : memref<256x32xf32, #tpu.memory_space<vmem>>, vector<256x32xf32>
    %1 = arith.truncf %0 : vector<256x32xf32> to vector<256x32xbf16>
    %c0_1 = arith.constant 0 : index
    %c0_2 = arith.constant 0 : index
    %2 = vector.load %arg2[%c0_1, %c0_2] : memref<64x32xbf16, #tpu.memory_space<vmem>>, vector<64x32xbf16>
    %3 = tpu.transpose %1, [1, 0] : vector<256x32xbf16> -> vector<32x256xbf16>
    %cst = arith.constant dense<0.000000e+00> : vector<64x256xf32>
    %4 = tpu.matmul %2, %3, %cst {dimension_numbers = #tpu.dot_dimension_numbers<[1], [0], [0], [1], [0, 0, 1, 1], [], []>} : vector<64x32xbf16>, vector<32x256xbf16>, vector<64x256xf32> -> vector<64x256xf32>
    %c0_3 = arith.constant 0 : index
    %c0_4 = arith.constant 0 : index
    %5 = vector.load %arg3[%c0_3, %c0_4] : memref<64x1xf32, #tpu.memory_space<vmem>>, vector<64x1xf32>
    %6 = vector.broadcast %5 : vector<64x1xf32> to vector<64x256xf32>
    %7 = arith.addf %4, %6 : vector<64x256xf32>
    %cst_5 = arith.constant 0.000000e+00 : f32
    %8 = vector.broadcast %cst_5 : f32 to vector<64x256xf32>
    %9 = arith.cmpf oge, %7, %8 : vector<64x256xf32>
    %cst_6 = arith.constant 0.00999999977 : f32
    %10 = vector.broadcast %cst_6 : f32 to vector<64x256xf32>
    %11 = arith.mulf %10, %7 : vector<64x256xf32>
    %12 = arith.select %9, %7, %11 : vector<64x256xi1>, vector<64x256xf32>
    %c0_7 = arith.constant 0 : index
    %c0_8 = arith.constant 0 : index
    %13 = vector.load %arg4[%c0_7, %c0_8] : memref<32x64xbf16, #tpu.memory_space<vmem>>, vector<32x64xbf16>
    %14 = arith.truncf %12 : vector<64x256xf32> to vector<64x256xbf16>
    %cst_9 = arith.constant dense<0.000000e+00> : vector<32x256xf32>
    %15 = tpu.matmul %13, %14, %cst_9 {dimension_numbers = #tpu.dot_dimension_numbers<[1], [0], [0], [1], [0, 0, 1, 1], [], []>} : vector<32x64xbf16>, vector<64x256xbf16>, vector<32x256xf32> -> vector<32x256xf32>
    %c0_10 = arith.constant 0 : index
    %c0_11 = arith.constant 0 : index
    %16 = vector.load %arg5[%c0_10, %c0_11] : memref<32x1xf32, #tpu.memory_space<vmem>>, vector<32x1xf32>
    %17 = vector.broadcast %16 : vector<32x1xf32> to vector<32x256xf32>
    %18 = arith.addf %15, %17 : vector<32x256xf32>
    %cst_12 = arith.constant 0.000000e+00 : f32
    %19 = vector.broadcast %cst_12 : f32 to vector<32x256xf32>
    %20 = arith.cmpf oge, %18, %19 : vector<32x256xf32>
    %cst_13 = arith.constant 0.00999999977 : f32
    %21 = vector.broadcast %cst_13 : f32 to vector<32x256xf32>
    %22 = arith.mulf %21, %18 : vector<32x256xf32>
    %23 = arith.select %20, %18, %22 : vector<32x256xi1>, vector<32x256xf32>
    %c0_14 = arith.constant 0 : index
    %c0_15 = arith.constant 0 : index
    %24 = vector.load %arg6[%c0_14, %c0_15] : memref<32x1xf32, #tpu.memory_space<vmem>>, vector<32x1xf32>
    %25 = vector.broadcast %24 : vector<32x1xf32> to vector<32x256xf32>
    %26 = arith.mulf %25, %23 : vector<32x256xf32>
    %cst_16 = arith.constant dense<0.000000e+00> : vector<256xf32>
    %27 = vector.multi_reduction <add>, %26, %cst_16 [0] : vector<32x256xf32> to vector<256xf32>
    %28 = vector.shape_cast %27 : vector<256xf32> to vector<1x256xf32>
    %c0_17 = arith.constant 0 : index
    %c0_18 = arith.constant 0 : index
    %29 = vector.load %arg7[%c0_17, %c0_18] : memref<1x1xf32, #tpu.memory_space<vmem>>, vector<1x1xf32>
    %30 = vector.broadcast %29 : vector<1x1xf32> to vector<1x256xf32>
    %31 = arith.addf %28, %30 : vector<1x256xf32>
    %32 = math.sin %31 : vector<1x256xf32>
    %cst_19 = arith.constant 1.000000e+00 : f32
    %33 = vector.broadcast %cst_19 : f32 to vector<1x256xf32>
    %34 = arith.addf %32, %33 : vector<1x256xf32>
    %cst_20 = arith.constant 5.000000e-01 : f32
    %35 = vector.broadcast %cst_20 : f32 to vector<1x256xf32>
    %36 = arith.mulf %34, %35 : vector<1x256xf32>
    %c0_21 = arith.constant 0 : index
    %c0_22 = arith.constant 0 : index
    %37 = vector.load %arg8[%c0_21, %c0_22] : memref<1x256xf32, #tpu.memory_space<vmem>>, vector<1x256xf32>
    tpu.vector_store %arg8[%c0_21, %c0_22], %36 {strides = array<i32>} : memref<1x256xf32, #tpu.memory_space<vmem>>, vector<1x256xf32>,
    return
  }
  func.func @transform_0(%arg0: i32) -> (i32, i32) {
    %c0_i32 = arith.constant 0 : i32
    %c0_i32_0 = arith.constant 0 : i32
    return %arg0, %c0_i32 : i32, i32
  }
  func.func @transform_1(%arg0: i32) -> (i32, i32) {
    %c0_i32 = arith.constant 0 : i32
    %c0_i32_0 = arith.constant 0 : i32
    %c0_i32_1 = arith.constant 0 : i32
    return %c0_i32, %c0_i32_0 : i32, i32
  }
  func.func @transform_2(%arg0: i32) -> (i32, i32) {
    %c0_i32 = arith.constant 0 : i32
    %c0_i32_0 = arith.constant 0 : i32
    %c0_i32_1 = arith.constant 0 : i32
    return %c0_i32, %c0_i32_0 : i32, i32
  }
  func.func @transform_3(%arg0: i32) -> (i32, i32) {
    %c0_i32 = arith.constant 0 : i32
    %c0_i32_0 = arith.constant 0 : i32
    %c0_i32_1 = arith.constant 0 : i32
    return %c0_i32, %c0_i32_0 : i32, i32
  }
  func.func @transform_4(%arg0: i32) -> (i32, i32) {
    %c0_i32 = arith.constant 0 : i32
    %c0_i32_0 = arith.constant 0 : i32
    %c0_i32_1 = arith.constant 0 : i32
    return %c0_i32, %c0_i32_0 : i32, i32
  }
  func.func @transform_5(%arg0: i32) -> (i32, i32) {
    %c0_i32 = arith.constant 0 : i32
    %c0_i32_0 = arith.constant 0 : i32
    %c0_i32_1 = arith.constant 0 : i32
    return %c0_i32, %c0_i32_0 : i32, i32
  }
  func.func @transform_6(%arg0: i32) -> (i32, i32) {
    %c0_i32 = arith.constant 0 : i32
    %c0_i32_0 = arith.constant 0 : i32
    %c0_i32_1 = arith.constant 0 : i32
    return %c0_i32, %c0_i32_0 : i32, i32
  }
  func.func @transform_7(%arg0: i32) -> (i32, i32) {
    %c0_i32 = arith.constant 0 : i32
    %c0_i32_0 = arith.constant 0 : i32
    return %c0_i32, %arg0 : i32, i32
  }
}

</mosaic_0001>

<bundles_post_ra>
// kernel: tpu_custom_call.1
= control target key start
LH: loop header
LB: loop body
LE: loop exit
PB: predicated region body
PF: predicated region fallthrough
CT: control target
= control target key end

     0   :  { %s1656_s0 = inlined_call_operand.vmem [shape: f32[1024,32], index: 0, kind: input, shape index: {}]   ;;  %s1657_s1 = inlined_call_operand.vmem [shape: bf16[64,32], index: 1, kind: input, shape index: {}]   ;;  %s1658_s2 = inlined_call_operand.vmem [shape: f32[64,1], index: 2, kind: input, shape index: {}]   ;;  %s1659_s3 = inlined_call_operand.vmem [shape: bf16[32,64], index: 3, kind: input, shape index: {}]   ;;  %s1660_s4 = inlined_call_operand.vmem [shape: f32[32,1], index: 4, kind: input, shape index: {}]   ;;  %s1661_s5 = inlined_call_operand.vmem [shape: f32[32,1], index: 5, kind: input, shape index: {}]   ;;  %s1662_s6 = inlined_call_operand.<no memory space> [shape: f32[1,1], index: 6, kind: input, shape index: {}]   ;;  %s1663_s7 = inlined_call_operand.hbm [shape: f32[1,1024], index: 7, kind: output, shape index: {}]  }
   0x1   :  { %v12_v0 = vstv %s1662_s6 }
   0x2   :  { %13 = vst [vmem:[#allocation2] sm:$0x1] %v12_v0 }
   0x3   :  { %14 = vsyncpa [#allocation4], 0 }
   0x4   :  { %16 = vsyncpa [#allocation4 + $0x1], 0  ;;  %s1340_s26 = smov 0   ;;  %s1342_s27 = smov 0  }
   0x5   :  { %s1344_s28 = smov 0   ;;  %s1346_s29 = smov 0  }
   0x6 LB: > { %s1089_s6 = sadd.s32 4294967295, %s1286_s29   ;;  %s1090_s30 = sadd.s32 4294967294, %s1286_s29   ;;  %s1286_s29 = sphi %s1346_s29, %s1671_s29   ;;  %s1282_s28 = sphi %s1344_s28, %s1670_s28   ;;  %s1278_s27 = sphi %s1342_s27, %s1669_s27   ;;  %s1274_s26 = sphi %s1340_s26, %s1668_s26  }
   0x7   : > { %s1363_s8 = sadd.s32 1, %s1286_s29   ;;  %s181_s9 = sadd.s32 1, %s1282_s28 }
   0x8   : > { %s178_s10 = ssub.s32 %s1286_s29, %s1363_s8  ;;  %p191_p0 = scmp.ne.s32.totalorder %s1282_s28, %s1278_s27 }
   0x9   : > { %p179_p1 = scmp.eq.s32.totalorder %s178_s10, 0  ;;  %p192_p2 = scmp.eq.s32.totalorder %s1089_s6, 3 }
   0xa   : > { %p197_p3 = scmp.ne.s32.totalorder %s1278_s27, %s1274_s26  ;;  %p198_p4 = scmp.eq.s32.totalorder %s1090_s30, 3 }
   0xb   : > { %s1373_s11 = scalar_select %p179_p1, %s1282_s28, %s181_s9  }
   0xc   : > { %p1375_p5 = por %p192_p2, %p191_p0  ;;  %p1379_p6 = por %p198_p4, %p197_p3 }
   0xd   : > { %p1093_p7 = scmp.ge.s32.totalorder %s1286_s29, 1  ;;  %p243_p8 = scmp.lt.s32.totalorder %s1286_s29, 5 }
   0xf   : > { %p244_p9 = pnand %p1093_p7, %p243_p8 }
  0x10   : > { %s1385_s14 = sshll.u32 (!%p244_p9), %s1089_s6, 5 }
  0x11   : > { %247 = sbr.rel (%p244_p9) target bundleno = 683 (0x2ab), region = 48  ;;  %p276_p10 = scmp.lt.s32.totalorder (!%p244_p9), %s1385_s14, 127 }
  0x12   : > { %s1029_s30 = scalar_lea.hbm (!%p244_p9), %s1663_s7, %s1385_s14 }
  0x16   : > { %v1391_v1 = vld [vmem:[%s1657_s1] sm:$0xff]   ;;  %vm407_vm0 = vcmask 261120   ;;  %s277_s17 = scalar_select %p276_p10, %s1385_s14, 127  ;;  %v1288_v2 = vmov 0   ;;  %v345_v3 = vld [vmem:[%s1658_s2 + $0x30] sm:$0xff]  ;;  %v346_v5 = vld [vmem:[%s1658_s2 + $0x38] sm:$0xff] }
  0x17   : > { %1139 = vmatprep.mubr.msk.bf16.mxu0 %vm407_vm0, %v1391_v1  ;;  %1210 = vset.pattern.permute.xlu0 %v1288_v2  ;;  %v343_v4 = vld [vmem:[%s1658_s2 + $0x20] sm:$0xff]  ;;  %v344_v6 = vld [vmem:[%s1658_s2 + $0x28] sm:$0xff]  ;;  %v341_v18 = vld [vmem:[%s1658_s2 + $0x10] sm:$0xff] }
  0x18   : > { %1211 = vset.pattern.permute.xlu1 %v1288_v2  ;;  %674 = vmatprep.mubr.bf16.mxu1 %v1288_v2  ;;  %s1096_s20 = sshll.u32 %s277_s17, 3  ;;  %v342_v20 = vld [vmem:[%s1658_s2 + $0x18] sm:$0xff]  ;;  %v339_v24 = vld [vmem:[%s1658_s2] sm:$0xff]  ;;  %v340_v25 = vld [vmem:[%s1658_s2 + $0x8] sm:$0xff] }
  0x19   : > { %379 = vperm.xlu0 %1210, %v345_v3   ;;  %s1408_s25 = scalar_lea.vmem %s1656_s0, %s1096_s20  ;;  %369 = vperm.xlu1 %1211, %v343_v4   ;;  %v601_v30 = vld [vmem:[%s1660_s4] sm:$0xff]  ;;  %v602_v31 = vld [vmem:[%s1660_s4 + $0x8] sm:$0xff]  ;;  %v603_v35 = vld [vmem:[%s1660_s4 + $0x10] sm:$0xff]  ;;  %s272_s20 = sand.u32 1, %s1278_s27  }
  0x1a   : > { %v313_v7 = vld [vmem:[%s1408_s25 + $0xf0] sm:$0xff]  ;;  %v314_v8 = vld [vmem:[%s1408_s25 + $0xf8] sm:$0xff]  ;;  %v311_v12 = vld [vmem:[%s1408_s25 + $0xe0] sm:$0xff]  ;;  %s1094_s21 = sshll.u32 %s272_s20, 1  ;;  %s1017_s9 = scalar_lea.sflag [#allocation4], %s272_s20 }
  0x1b   : > { %v297_v9 = vld [vmem:[%s1408_s25 + $0x70] sm:$0xff]  ;;  %v330_v10 = vpack.c.bf16 %v314_v8, %v313_v7  ;;  %v298_v11 = vld [vmem:[%s1408_s25 + $0x78] sm:$0xff]  ;;  %v312_v13 = vld [vmem:[%s1408_s25 + $0xe8] sm:$0xff]  ;;  %s274_s22 = scalar_lea.vmem [#allocation3], %s1094_s21 }
  0x1c   : > { %v322_v14 = vpack.c.bf16 %v298_v11, %v297_v9  ;;  %v329_v15 = vpack.c.bf16 %v312_v13, %v311_v12  ;;  %v295_v16 = vld [vmem:[%s1408_s25 + $0x60] sm:$0xff]  ;;  %v296_v17 = vld [vmem:[%s1408_s25 + $0x68] sm:$0xff]  ;;  %v309_v22 = vld [vmem:[%s1408_s25 + $0xd0] sm:$0xff]  ;;  %s1031_s23 = sshll.u32 %s274_s22, 4  ;;  %s1032_s23 = int_to_ptr.vmem [resolvable:$true] %s1031_s23 }
  0x1d   : > { %384 = vperm.xlu0 %1210, %v346_v5   ;;  %1147 = vmatprep.subr.msk.bf16.mxu0 %vm407_vm0, %v330_v10  ;;  %v321_v21 = vpack.c.bf16 %v296_v17, %v295_v16  ;;  %v310_v23 = vld [vmem:[%s1408_s25 + $0xd8] sm:$0xff]  ;;  %v293_v28 = vld [vmem:[%s1408_s25 + $0x50] sm:$0xff]  ;;  %v307_v33 = vld [vmem:[%s1408_s25 + $0xc0] sm:$0xff]  ;;  %s1226_s10 = scalar_lea.vmem %s1032_s23, 32 }
  0x1e   : > { %374 = vperm.xlu1 %1211, %v344_v6   ;;  %v442_v19 = vsel %vm407_vm0, %v322_v14, 0  ;;  %v328_v27 = vpack.c.bf16 %v310_v23, %v309_v22  ;;  %v294_v29 = vld [vmem:[%s1408_s25 + $0x58] sm:$0xff]  ;;  %v308_v34 = vld [vmem:[%s1408_s25 + $0xc8] sm:$0xff]  ;;  %v291_v39 = vld [vmem:[%s1408_s25 + $0x40] sm:$0xff]  ;;  %p1227_p11 = scmp.ne.s32.totalorder %s1032_s23, %s1226_s10 }
  0x1f   : > { %1124 = vmatpush3.bf16.xpose.msra.mxu0 %v442_v19  ;;  %v439_v26 = vsel %vm407_vm0, %v321_v21, 0  ;;  %v320_v32 = vpack.c.bf16 %v294_v29, %v293_v28  ;;  %v604_v36 = vld [vmem:[%s1660_s4 + $0x18] sm:$0xff]  ;;  %v327_v38 = vpack.c.bf16 %v308_v34, %v307_v33  ;;  %v292_v40 = vld [vmem:[%s1408_s25 + $0x48] sm:$0xff]  ;;  %v719_v41 = vld [vmem:[%s1661_s5] sm:$0xff] }
  0x20   : > { %1148 = vmatprep.subr.msk.bf16.mxu0 %vm407_vm0, %v329_v15  ;;  %v720_v42 = vld [vmem:[%s1661_s5 + $0x8] sm:$0xff]  ;;  %v319_v43 = vpack.c.bf16 %v292_v40, %v291_v39  ;;  %v305_v44 = vld [vmem:[%s1408_s25 + $0xb0] sm:$0xff]  ;;  %v306_v45 = vld [vmem:[%s1408_s25 + $0xb8] sm:$0xff]  ;;  %p1228_p12 = pnand %p1227_p11, %p1375_p5 }
  0x21   : > { %359 = vperm.xlu0 %1210, %v341_v18   ;;  %v436_v37 = vsel %vm407_vm0, %v320_v32, 0  ;;  %v721_v46 = vld [vmem:[%s1661_s5 + $0x10] sm:$0xff]  ;;  %v722_v47 = vld [vmem:[%s1661_s5 + $0x18] sm:$0xff]  ;;  %v326_v49 = vpack.c.bf16 %v306_v45, %v305_v44  ;;  %v769_v52 = vld [vmem:[#allocation2] sm:$0x1] }
  0x22   : > { %364 = vperm.xlu1 %1211, %v342_v20   ;;  %v433_v48 = vsel %vm407_vm0, %v319_v43, 0  ;;  %v289_v50 = vld [vmem:[%s1408_s25 + $0x30] sm:$0xff]  ;;  %v290_v51 = vld [vmem:[%s1408_s25 + $0x38] sm:$0xff]  ;;  %v303_v54 = vld [vmem:[%s1408_s25 + $0xa0] sm:$0xff]  ;;  %p1229_p13 = pneg %p1228_p12 }
  0x23   : > { %v318_v53 = vpack.c.bf16 %v290_v51, %v289_v50  ;;  %v304_v55 = vld [vmem:[%s1408_s25 + $0xa8] sm:$0xff]  ;;  %v287_v58 = vld [vmem:[%s1408_s25 + $0x20] sm:$0xff]  ;;  %v301_v61 = vld [vmem:[%s1408_s25 + $0x90] sm:$0xff] }
  0x24   : > { %v325_v57 = vpack.c.bf16 %v304_v55, %v303_v54  ;;  %v288_v59 = vld [vmem:[%s1408_s25 + $0x28] sm:$0xff]  ;;  %v302_v62 = vld [vmem:[%s1408_s25 + $0x98] sm:$0xff]  ;;  %v285_v3 = vld [vmem:[%s1408_s25 + $0x10] sm:$0xff] }
  0x25   : > { %349 = vperm.xlu0 %1210, %v339_v24   ;;  %v430_v56 = vsel %vm407_vm0, %v318_v53, 0  ;;  %v317_v60 = vpack.c.bf16 %v288_v59, %v287_v58  ;;  %v324_v0 = vpack.c.bf16 %v302_v62, %v301_v61  ;;  %v286_v4 = vld [vmem:[%s1408_s25 + $0x18] sm:$0xff]  ;;  %v299_v6 = vld [vmem:[%s1408_s25 + $0x80] sm:$0xff]  ;;  %v300_v7 = vld [vmem:[%s1408_s25 + $0x88] sm:$0xff] }
  0x26   : > { %354 = vperm.xlu1 %1211, %v340_v25   ;;  %v316_v5 = vpack.c.bf16 %v286_v4, %v285_v3  ;;  %v323_v9 = vpack.c.bf16 %v300_v7, %v299_v6  ;;  %v283_v10 = vld [vmem:[%s1408_s25] sm:$0xff]  ;;  %v284_v11 = vld [vmem:[%s1408_s25 + $0x8] sm:$0xff]  ;;  %v1214_v15 = vld [vmem:[%s1657_s1 + $0x10] sm:$0xff]   ;;  %s1296_s25 = smov [#allocation3]  }
  0x27   : > { %1126 = vmatpush3.bf16.xpose.msra.mxu0 %v439_v26  ;;  %v427_v63 = vsel %vm407_vm0, %v317_v60, 0  ;;  %v315_v12 = vpack.c.bf16 %v284_v11, %v283_v10  ;;  %v1213_v14 = vld [vmem:[%s1657_s1 + $0x8] sm:$0xff]   ;;  %v1215_v16 = vld [vmem:[%s1657_s1 + $0x18] sm:$0xff]   ;;  %s1230_s15 = sshll.u32 %s1296_s25, 4  ;;  %s1231_s15 = int_to_ptr.vmem [resolvable:$false] %s1230_s15 }
  0x28   : > { %1149 = vmatprep.subr.msk.bf16.mxu0 %vm407_vm0, %v328_v27  ;;  %v424_v8 = vsel %vm407_vm0, %v316_v5, 0  ;;  %s1232_s16 = scalar_lea.vmem %s1231_s15, 64  ;;  %p1233_p0 = scmp.lt.s32.totalorder %s1032_s23, %s1231_s15 }
  0x29   : > { %607 = vperm.xlu0 %1210, %v601_v30   ;;  %v421_v13 = vsel %vm407_vm0, %v315_v12, 0  ;;  %p1234_p1 = scmp.lt.s32.totalorder %s1232_s16, %s1226_s10 }
  0x2a   : > { %612 = vperm.xlu1 %1211, %v602_v31  }
  0x2b   : > { %p1235_p2 = por %p1234_p1, %p1233_p0 }
  0x2d   : > { %617 = vperm.xlu0 %1210, %v603_v35   ;;  %p1236_p3 = pnand %p1235_p2, %p1229_p13 }
  0x2e   : > { %622 = vperm.xlu1 %1211, %v604_v36  }
  0x2f   : > { %1128 = vmatpush3.bf16.xpose.msra.mxu0 %v436_v37 }
  0x30   : > { %1150 = vmatprep.subr.msk.bf16.mxu0 %vm407_vm0, %v327_v38 }
  0x31   : > { %725 = vperm.xlu0 %1210, %v719_v41  }
  0x32   : > { %730 = vperm.xlu1 %1211, %v720_v42  }
  0x35   : > { %735 = vperm.xlu0 %1210, %v721_v46  }
  0x36   : > { %740 = vperm.xlu1 %1211, %v722_v47  }
  0x37   : > { %1130 = vmatpush3.bf16.xpose.msra.mxu0 %v433_v48 }
  0x38   : > { %1151 = vmatprep.subr.msk.bf16.mxu0 %vm407_vm0, %v326_v49 }
  0x39   : > { %772 = vperm.xlu0 %1210, %v769_v52  }
  0x3f   : > { %1132 = vmatpush3.bf16.xpose.msra.mxu0 %v430_v56 }
  0x40   : > { %1152 = vmatprep.subr.msk.bf16.mxu0 %vm407_vm0, %v325_v57 }
  0x47   : > { %1134 = vmatpush3.bf16.xpose.msra.mxu0 %v427_v63 }
  0x48   : > { %1153 = vmatprep.subr.msk.bf16.mxu0 %vm407_vm0, %v324_v0 }
  0x4f   : > { %1136 = vmatpush3.bf16.xpose.msra.mxu0 %v424_v8 }
  0x50   : > { %1154 = vmatprep.subr.msk.bf16.mxu0 %vm407_vm0, %v323_v9 }
  0x57   : > { %1138 = vmatpush3.bf16.xpose.msra.mxu0 %v421_v13 }
  0x5e   : > { %1140 = vmatmul.mubr.msk.bf16.vlgmr.msra.gmra.mxu0 %vm407_vm0, %v1391_v1 }
  0x5f   : > { %1141 = vmatprep.mubr.msk.bf16.mxu0 %vm407_vm0, %v1213_v14 }
  0x66   : > { %1142 = vmatmul.mubr.msk.bf16.gmra.mxu0 %vm407_vm0, %v1213_v14 }
  0x67   : > { %1143 = vmatprep.mubr.msk.bf16.mxu0 %vm407_vm0, %v1214_v15 }
  0x6e   : > { %1144 = vmatmul.mubr.msk.bf16.gmra.mxu0 %vm407_vm0, %v1214_v15 }
  0x6f   : > { %1145 = vmatprep.mubr.msk.bf16.mxu0 %vm407_vm0, %v1215_v16 }
  0x76   : > { %1146 = vmatmul.mubr.msk.bf16.gmra.mxu0 %vm407_vm0, %v1215_v16 }
  0x94   : > { %v370_v20 = vpop.permute.xlu1 %369  ;;  %v380_v22 = vpop.permute.xlu0 %379 }
  0x98   : > { %v385_v27 = vpop.permute.xlu0 %384 }
  0x99   : > { %v375_v25 = vpop.permute.xlu1 %374 }
  0x9c   : > { %v360_v32 = vpop.permute.xlu0 %359 }
  0x9d   : > { %v365_v30 = vpop.permute.xlu1 %364 }
  0xa0   : > { %v350_v38 = vpop.permute.xlu0 %349 }
  0xa1   : > { %v355_v35 = vpop.permute.xlu1 %354 }
 0x11e   : > { %v1517_v1 = vpop.f32.mrf.mxu0 }
 0x11f   : > { %v503_v16 = vadd.f32 %v1517_v1, %v350_v38 }
 0x120   : > { %v504_v17 = vpop.f32.mrf.mxu0 }
 0x121   : > { %v1519_v40 = vadd.f32 %v504_v17, %v350_v38  ;;  %vm541_vm0 = vcmp.ge.f32.partialorder %v503_v16, 0.0 }
 0x122   : > { %v506_v18 = vpop.f32.mrf.mxu0 }
 0x123   : > { %v1521_v41 = vadd.f32 %v506_v18, %v355_v35  ;;  %vm542_vm14 = vcmp.ge.f32.partialorder %v1519_v40, 0.0 }
 0x124   : > { %v508_v19 = vpop.f32.mrf.mxu0 }
 0x125   : > { %v1523_v42 = vadd.f32 %v508_v19, %v355_v35  ;;  %v558_v19 = vmul.f32 0.01, %v1519_v40  ;;  %vm543_vm15 = vcmp.ge.f32.partialorder %v1521_v41, 0.0  ;;  %v608_v35 = vpop.permute.xlu0 %607 }
 0x126   : > { %v512_v21 = vpop.f32.mrf.mxu0 }
 0x127   : > { %v1525_v45 = vadd.f32 %v512_v21, %v360_v32  ;;  %v560_v14 = vmul.f32 0.01, %v1523_v42  ;;  %vm544_vm12 = vcmp.ge.f32.partialorder %v1523_v42, 0.0 }
 0x128   : > { %v514_v23 = vpop.f32.mrf.mxu0 }
 0x129   : > { %v515_v46 = vadd.f32 %v514_v23, %v360_v32  ;;  %v561_v17 = vmul.f32 0.01, %v1525_v45  ;;  %vm545_vm13 = vcmp.ge.f32.partialorder %v1525_v45, 0.0  ;;  %v618_v38 = vpop.permute.xlu0 %617 }
 0x12a   : > { %v516_v24 = vpop.f32.mrf.mxu0 }
 0x12b   : > { %v517_v49 = vadd.f32 %v516_v24, %v365_v30  ;;  %v562_v8 = vmul.f32 0.01, %v515_v46  ;;  %vm546_vm10 = vcmp.ge.f32.partialorder %v515_v46, 0.0  ;;  %v576_v24 = vsel %vm544_vm12, %v1523_v42, %v560_v14 }
 0x12c   : > { %v518_v26 = vpop.f32.mrf.mxu0 }
 0x12d   : > { %v519_v50 = vadd.f32 %v518_v26, %v365_v30  ;;  %v563_v11 = vmul.f32 0.01, %v517_v49  ;;  %vm547_vm11 = vcmp.ge.f32.partialorder %v517_v49, 0.0  ;;  %v578_v21 = vsel %vm546_vm10, %v515_v46, %v562_v8 }
 0x12e   : > { %v522_v28 = vpop.f32.mrf.mxu0  ;;  %v577_v26 = vsel %vm545_vm13, %v1525_v45, %v561_v17 }
 0x12f   : > { %v523_v57 = vadd.f32 %v522_v28, %v370_v20  ;;  %v564_v61 = vmul.f32 0.01, %v519_v50  ;;  %vm548_vm8 = vcmp.ge.f32.partialorder %v519_v50, 0.0  ;;  %v579_v1 = vsel %vm547_vm11, %v517_v49, %v563_v11 }
 0x130   : > { %v524_v29 = vpop.f32.mrf.mxu0  ;;  %v574_v28 = vsel %vm542_vm14, %v1519_v40, %v558_v19 }
 0x131   : > { %v525_v47 = vadd.f32 %v524_v29, %v370_v20  ;;  %v565_v5 = vmul.f32 0.01, %v523_v57  ;;  %vm549_vm9 = vcmp.ge.f32.partialorder %v523_v57, 0.0  ;;  %v580_v15 = vsel %vm548_vm8, %v519_v50, %v564_v61 }
 0x132   : > { %v526_v31 = vpop.f32.mrf.mxu0  ;;  %v596_v23 = vpack.c.bf16 %v580_v15, %v578_v21  ;;  %v594_v29 = vpack.c.bf16 %v576_v24, %v574_v28 }
 0x133   : > { %v527_v51 = vadd.f32 %v526_v31, %v375_v25  ;;  %v566_v59 = vmul.f32 0.01, %v525_v47  ;;  %vm550_vm6 = vcmp.ge.f32.partialorder %v525_v47, 0.0  ;;  %v581_v18 = vsel %vm549_vm9, %v523_v57, %v565_v5 }
 0x134   : > { %v528_v33 = vpop.f32.mrf.mxu0 }
 0x135   : > { %v529_v36 = vadd.f32 %v528_v33, %v375_v25  ;;  %v567_v62 = vmul.f32 0.01, %v527_v51  ;;  %vm551_vm7 = vcmp.ge.f32.partialorder %v527_v51, 0.0  ;;  %v582_v10 = vsel %vm550_vm6, %v525_v47, %v566_v59  ;;  %v1216_v33 = vld [vmem:[%s1659_s3] sm:$0xff]   ;;  %v726_v47 = vpop.permute.xlu0 %725 }
 0x136   : > { %v532_v34 = vpop.f32.mrf.mxu0  ;;  %v557_v25 = vmul.f32 0.01, %v503_v16 }
 0x137   : > { %v533_v43 = vadd.f32 %v532_v34, %v380_v22  ;;  %v568_v52 = vmul.f32 0.01, %v529_v36  ;;  %vm552_vm2 = vcmp.ge.f32.partialorder %v529_v36, 0.0  ;;  %v583_v13 = vsel %vm551_vm7, %v527_v51, %v567_v62  ;;  %v1217_v34 = vld [vmem:[%s1659_s3 + $0x8] sm:$0xff]  }
 0x138   : > { %v534_v37 = vpop.f32.mrf.mxu0  ;;  %v597_v20 = vpack.c.bf16 %v583_v13, %v581_v18  ;;  %v573_v31 = vsel %vm541_vm0, %v503_v16, %v557_v25 }
 0x139   : > { %v535_v39 = vadd.f32 %v534_v37, %v380_v22  ;;  %v569_v58 = vmul.f32 0.01, %v533_v43  ;;  %vm553_vm5 = vcmp.ge.f32.partialorder %v533_v43, 0.0  ;;  %v584_v4 = vsel %vm552_vm2, %v529_v36, %v568_v52  ;;  %v613_v36 = vpop.permute.xlu1 %612 }
 0x13a   : > { %v536_v44 = vpop.f32.mrf.mxu0  ;;  %v598_v12 = vpack.c.bf16 %v584_v4, %v582_v10  ;;  %v559_v22 = vmul.f32 0.01, %v1521_v41 }
 0x13b   : > { %v537_v48 = vadd.f32 %v536_v44, %v385_v27  ;;  %v570_v54 = vmul.f32 0.01, %v535_v39  ;;  %vm554_vm3 = vcmp.ge.f32.partialorder %v535_v39, 0.0  ;;  %v585_v7 = vsel %vm553_vm5, %v533_v43, %v569_v58 }
 0x13c   : > { %v538_v53 = vpop.f32.mrf.mxu0  ;;  %v575_v30 = vsel %vm543_vm15, %v1521_v41, %v559_v22  ;;  %v775_v22 = vlaneseq }
 0x13d   : > { %v571_v55 = vmul.f32 0.01, %v537_v48  ;;  %v539_v56 = vadd.f32 %v538_v53, %v385_v27  ;;  %vm555_vm1 = vcmp.ge.f32.partialorder %v537_v48, 0.0  ;;  %v586_v0 = vsel %vm554_vm3, %v535_v39, %v570_v54  ;;  %v623_v43 = vpop.permute.xlu1 %622 }
 0x13e   : > { %v595_v27 = vpack.c.bf16 %v579_v1, %v577_v26  ;;  %v593_v32 = vpack.c.bf16 %v575_v30, %v573_v31 }
 0x13f   : > { %v572_v60 = vmul.f32 0.01, %v539_v56  ;;  %vm556_vm4 = vcmp.ge.f32.partialorder %v539_v56, 0.0  ;;  %v587_v63 = vsel %vm555_vm1, %v537_v48, %v571_v55  ;;  %vm635_vm1 = vcmask 523264  }
 0x140   : > { %v599_v9 = vpack.c.bf16 %v587_v63, %v585_v7  ;;  %v736_v63 = vpop.permute.xlu0 %735 }
 0x141   : > { %v588_v3 = vsel %vm556_vm4, %v539_v56, %v572_v60  ;;  %v731_v56 = vpop.permute.xlu1 %730 }
 0x142   : > { %v600_v6 = vpack.c.bf16 %v588_v3, %v586_v0 }
 0x144   : > { %650 = vmatprep.subr.bf16.mxu1 %v600_v6 }
 0x145   : > { %651 = vmatpush1.bf16.msra.mxu1 %v599_v9  ;;  %v741_v15 = vpop.permute.xlu1 %740 }
 0x146   : > { %652 = vmatprep.subr.bf16.mxu1 %v598_v12 }
 0x149   : > { %653 = vmatpush1.bf16.msra.mxu1 %v597_v20 }
 0x14a   : > { %654 = vmatprep.subr.bf16.mxu1 %v596_v23 }
 0x14d   : > { %655 = vmatpush1.bf16.msra.mxu1 %v595_v27  ;;  %v1552_v27 = vshrl.u32 %v775_v22, 7 }
 0x14e   : > { %656 = vmatprep.subr.bf16.mxu1 %v594_v29 }
 0x151   : > { %657 = vmatpush1.bf16.msra.mxu1 %v593_v32  ;;  %v777_v32 = vsub.s32 0, %v1552_v27 }
 0x154   : > { %1107 = vmatmul.mubr.msk.bf16.vlgmr.msra.gmra.mxu1 %vm635_vm1, %v1216_v33 }
 0x155   : > { %684 = vmatprep.mubr.bf16.mxu1 %v1288_v2 }
 0x15c   : > { %1108 = vmatmul.mubr.msk.bf16.gmra.mxu1 %vm635_vm1, %v1217_v34 }
 0x214   : > { %v676_v37 = vpop.f32.mrf.mxu1 }
 0x215   : > { %v677_v39 = vadd.f32 %v676_v37, %v608_v35 }
 0x216   : > { %v678_v40 = vpop.f32.mrf.mxu1 }
 0x217   : > { %v679_v41 = vadd.f32 %v678_v40, %v608_v35  ;;  %v703_v45 = vmul.f32 0.01, %v677_v39  ;;  %vm695_vm2 = vcmp.ge.f32.partialorder %v677_v39, 0.0  ;;  %v773_v35 = vpop.permute.xlu0 %772 }
 0x218   : > { %v680_v42 = vpop.f32.mrf.mxu1 }
 0x219   : > { %v681_v44 = vadd.f32 %v680_v42, %v613_v36  ;;  %vm696_vm4 = vcmp.ge.f32.partialorder %v679_v41, 0.0  ;;  %v704_v49 = vmul.f32 0.01, %v679_v41  ;;  %v711_v54 = vsel %vm695_vm2, %v677_v39, %v703_v45 }
 0x21a   : > { %v682_v46 = vpop.f32.mrf.mxu1  ;;  %v743_v5 = vmul.f32 %v726_v47, %v711_v54 }
 0x21b   : > { %vm697_vm3 = vcmp.ge.f32.partialorder %v681_v44, 0.0  ;;  %v705_v2 = vmul.f32 0.01, %v681_v44  ;;  %v683_v48 = vadd.f32 %v682_v46, %v613_v36  ;;  %v712_v60 = vsel %vm696_vm4, %v679_v41, %v704_v49 }
 0x21c   : > { %v686_v50 = vpop.f32.mrf.mxu1  ;;  %v744_v12 = vmul.f32 %v726_v47, %v712_v60 }
 0x21d   : > { %v713_v51 = vsel %vm697_vm3, %v681_v44, %v705_v2  ;;  %vm698_vm5 = vcmp.ge.f32.partialorder %v683_v48, 0.0  ;;  %v706_v52 = vmul.f32 0.01, %v683_v48  ;;  %v687_v53 = vadd.f32 %v686_v50, %v618_v38 }
 0x21e   : > { %v688_v55 = vpop.f32.mrf.mxu1  ;;  %v745_v61 = vmul.f32 %v731_v56, %v713_v51 }
 0x21f   : > { %v714_v57 = vsel %vm698_vm5, %v683_v48, %v706_v52  ;;  %vm699_vm6 = vcmp.ge.f32.partialorder %v687_v53, 0.0  ;;  %v707_v58 = vmul.f32 0.01, %v687_v53  ;;  %v689_v59 = vadd.f32 %v688_v55, %v618_v38 }
 0x220   : > { %v690_v62 = vpop.f32.mrf.mxu1  ;;  %v746_v6 = vmul.f32 %v731_v56, %v714_v57  ;;  %v751_v13 = vadd.f32 %v745_v61, %v743_v5  ;;  %v778_v38 = vrot.slane %v773_v35, %v777_v32  ;;  %v1291_v5 = vmov 2131351028  }
 0x221   : > { %v715_v0 = vsel %vm699_vm6, %v687_v53, %v707_v58  ;;  %vm700_vm7 = vcmp.ge.f32.partialorder %v689_v59, 0.0  ;;  %v708_v3 = vmul.f32 0.01, %v689_v59  ;;  %v691_v4 = vadd.f32 %v690_v62, %v623_v43 }
 0x222   : > { %v747_v7 = vmul.f32 %v736_v63, %v715_v0  ;;  %v692_v8 = vpop.f32.mrf.mxu1  ;;  %v760_v18 = vadd.f32 %v746_v6, %v744_v12  ;;  %v1293_v12 = vmov 920167782  }
 0x223   : > { %v716_v9 = vsel %vm700_vm7, %v689_v59, %v708_v3  ;;  %vm701_vm8 = vcmp.ge.f32.partialorder %v691_v4, 0.0  ;;  %v709_v10 = vmul.f32 0.01, %v691_v4  ;;  %v693_v11 = vadd.f32 %v692_v8, %v623_v43 }
 0x224   : > { %v748_v14 = vmul.f32 %v736_v63, %v716_v9  ;;  %v752_v19 = vadd.f32 %v751_v13, %v747_v7  ;;  %v1289_v63 = vmov 683565275   ;;  %v1290_v3 = vmov 2475754826  }
 0x225   : > { %v717_v16 = vsel %vm701_vm8, %v691_v4, %v709_v10  ;;  %vm702_vm9 = vcmp.ge.f32.partialorder %v693_v11, 0.0  ;;  %v710_v17 = vmul.f32 0.01, %v693_v11  ;;  %v1292_v10 = vmov 2102212464  }
 0x226   : > { %v749_v20 = vmul.f32 %v741_v15, %v717_v16  ;;  %v761_v23 = vadd.f32 %v760_v18, %v748_v14 }
 0x227   : > { %v718_v21 = vsel %vm702_vm9, %v693_v11, %v710_v17  ;;  %v1294_v17 = vmov 1326507024  }
 0x228   : > { %v753_v1 = vadd.f32 %v752_v19, %v749_v20  ;;  %v750_v24 = vmul.f32 %v741_v15, %v718_v21 }
 0x22a   : > { %v754_v25 = vrot.slane %v753_v1, 4  ;;  %v762_v26 = vadd.f32 %v761_v23, %v750_v24 }
 0x22c   : > { %v755_v28 = vadd.f32 %v754_v25, %v753_v1  ;;  %v763_v29 = vrot.slane %v762_v26, 4 }
 0x22e   : > { %v756_v30 = vrot.slane %v755_v28, 2  ;;  %v764_v31 = vadd.f32 %v763_v29, %v762_v26 }
 0x230   : > { %v757_v33 = vadd.f32 %v756_v30, %v755_v28  ;;  %v765_v34 = vrot.slane %v764_v31, 2 }
 0x232   : > { %v758_v36 = vrot.slane %v757_v33, 1  ;;  %v766_v37 = vadd.f32 %v765_v34, %v764_v31 }
 0x234   : > { %v759_v39 = vadd.f32 %v758_v36, %v757_v33  ;;  %v767_v40 = vrot.slane %v766_v37, 1 }
 0x236   : > { %v1555_v41 = vadd.f32 %v778_v38, %v759_v39  ;;  %v768_v42 = vadd.f32 %v767_v40, %v766_v37 }
 0x238   : > { %v784_v43 = vand.u32 2139095040, %v1555_v41  ;;  %v1558_v44 = vadd.f32 %v778_v38, %v768_v42  ;;  %v781_v45 = vand.u32 2147483647, %v1555_v41  ;;  %vm783_vm8 = vcmp.lt.s32.totalorder %v1555_v41, 0 }
 0x23a   : > { %v785_v46 = vshrl.u32 %v784_v43, 23  ;;  %v888_v47 = vand.u32 2139095040, %v1558_v44  ;;  %v788_v49 = vand.u32 8388607, %v781_v45  ;;  %v885_v50 = vand.u32 2147483647, %v1558_v44 }
 0x23b   : > { %vm1605_vm9 = vcmp.le.f32.partialorder %v781_v45, 0.7853982 }
 0x23c   : > { %v1109_v2 = vadd.s32 4294967169, %v785_v46  ;;  %v889_v48 = vshrl.u32 %v888_v47, 23  ;;  %v789_v54 = vor.u32 8388608, %v788_v49  ;;  %v892_v56 = vand.u32 8388607, %v885_v50 }
 0x23e   : > { %v791_v51 = vadd.s32 1, %v1109_v2  ;;  %v1113_v52 = vadd.s32 4294967169, %v889_v48  ;;  %v1567_v62 = vshll.u32 %v789_v54, 8  ;;  %v893_v7 = vor.u32 8388608, %v892_v56 }
 0x240   : > { %vm792_vm10 = vcmp.gt.s32.totalorder %v791_v51, 0  ;;  %v895_v53 = vadd.s32 1, %v1113_v52  ;;  %v933_v39 = vshll.u32 %v893_v7, 8 }
 0x241   : > { %v793_v55 = vsel %vm792_vm10, %v791_v51, 0  ;;  %vm887_vm10 = vcmp.lt.s32.totalorder %v1558_v44, 0 }
 0x242   : > { %v795_v57 = vand.u32 31, %v793_v55  ;;  %vm896_vm11 = vcmp.gt.s32.totalorder %v895_v53, 0  ;;  %v794_v59 = vshrl.u32 %v793_v55, 5 }
 0x243   : > { %v897_v58 = vsel %vm896_vm11, %v895_v53, 0  ;;  %vm886_vm11 = vcmp.le.f32.partialorder %v885_v50, 0.7853982 }
 0x244   : > { %v796_v60 = vsub.s32 32, %v795_v57  ;;  %v899_v61 = vand.u32 31, %v897_v58  ;;  %v798_v0 = vshll.u32 %v1289_v63, %v795_v57  ;;  %v801_v4 = vshll.u32 %v1290_v3, %v795_v57 }
 0x245   : > { %v804_v6 = vshll.u32 %v1291_v5, %v795_v57  ;;  %v807_v11 = vshll.u32 %v1292_v10, %v795_v57  ;;  %v810_v13 = vshll.u32 %v1293_v12, %v795_v57  ;;  %vm813_vm12 = vcmp.lt.s32.totalorder %v794_v59, 1 }
 0x246   : > { %v799_v8 = vshrl.u32 %v1290_v3, %v796_v60  ;;  %v802_v9 = vshrl.u32 %v1291_v5, %v796_v60  ;;  %v900_v14 = vsub.s32 32, %v899_v61  ;;  %v805_v15 = vshrl.u32 %v1292_v10, %v796_v60 }
 0x247   : > { %v808_v16 = vshrl.u32 %v1293_v12, %v796_v60  ;;  %v811_v18 = vshrl.u32 %v1294_v17, %v796_v60  ;;  %v797_v19 = vshrl.u32 %v1289_v63, %v796_v60  ;;  %vm814_vm13 = vcmp.lt.s32.totalorder %v794_v59, 2 }
 0x248   : > { %v800_v20 = vor.u32 %v799_v8, %v798_v0  ;;  %v803_v21 = vor.u32 %v802_v9, %v801_v4  ;;  %v806_v23 = vor.u32 %v805_v15, %v804_v6  ;;  %vm815_vm14 = vcmp.lt.s32.totalorder %v794_v59, 3 }
 0x249   : > { %v809_v1 = vor.u32 %v808_v16, %v807_v11  ;;  %v812_v24 = vor.u32 %v811_v18, %v810_v13  ;;  %vm816_vm15 = vcmp.lt.s32.totalorder %v794_v59, 4  ;;  %v903_v35 = vshrl.u32 %v1290_v3, %v900_v14 }
 0x24a   : > { %v817_v25 = vsel %vm813_vm12, %v797_v19, %v800_v20  ;;  %v821_v26 = vsel %vm813_vm12, %v800_v20, %v803_v21  ;;  %v818_v28 = vsel %vm816_vm15, %v806_v23, 2102212464  ;;  %v825_v30 = vsel %vm813_vm12, %v803_v21, %v806_v23 }
 0x24b   : > { %v822_v29 = vsel %vm816_vm15, %v809_v1, 920167782  ;;  %v826_v31 = vsel %vm816_vm15, %v812_v24, 1326507024  ;;  %v819_v32 = vsel %vm815_vm14, %v803_v21, %v818_v28  ;;  %v902_v38 = vshll.u32 %v1289_v63, %v899_v61 }
 0x24c   : > { %v823_v33 = vsel %vm815_vm14, %v806_v23, %v822_v29  ;;  %v827_v34 = vsel %vm815_vm14, %v809_v1, %v826_v31  ;;  %v898_v47 = vshrl.u32 %v897_v58, 5  ;;  %v820_v2 = vsel %vm814_vm13, %v817_v25, %v819_v32 }
 0x24d   : > { %v824_v36 = vsel %vm814_vm13, %v821_v26, %v823_v33  ;;  %v828_v37 = vsel %vm814_vm13, %v825_v30, %v827_v34  ;;  %v905_v48 = vshll.u32 %v1290_v3, %v899_v61  ;;  %v906_v49 = vshrl.u32 %v1291_v5, %v900_v14 }
 0x24e   : > { %v1575_v40 = vmul.u32.u64.low %v1567_v62, %v828_v37  ;;  %v1576_v42 = vmul.u32.u64.high %v1567_v62, %v828_v37, %v1575_v40  ;;  %v1579_v43 = vmul.u32.u64.low %v1567_v62, %v824_v36  ;;  %v1580_v46 = vmul.u32.u64.high %v1567_v62, %v824_v36, %v1579_v43 }
 0x24f   : > { %v904_v51 = vor.u32 %v903_v35, %v902_v38  ;;  %v908_v52 = vshll.u32 %v1291_v5, %v899_v61  ;;  %v909_v53 = vshrl.u32 %v1292_v10, %v900_v14  ;;  %v912_v54 = vshrl.u32 %v1293_v12, %v900_v14 }
 0x250   : > { %v907_v55 = vor.u32 %v906_v49, %v905_v48  ;;  %v911_v56 = vshll.u32 %v1292_v10, %v899_v61  ;;  %v914_v57 = vshll.u32 %v1293_v12, %v899_v61  ;;  %v915_v60 = vshrl.u32 %v1294_v17, %v900_v14 }
 0x251   : > { %v836_v0 = vmul.u32 %v1567_v62, %v820_v2  ;;  %vm838_vm0 = vc.u32 %v1576_v42, %v1579_v43  ;;  %v839_v4 = vadd.s32 1, %v1580_v46  ;;  %v910_v58 = vor.u32 %v909_v53, %v908_v52 }
 0x252   : > { %v913_v59 = vor.u32 %v912_v54, %v911_v56  ;;  %v916_v6 = vor.u32 %v915_v60, %v914_v57  ;;  %vm917_vm1 = vcmp.lt.s32.totalorder %v898_v47, 1  ;;  %vm920_vm2 = vcmp.lt.s32.totalorder %v898_v47, 4 }
 0x253   : > { %v840_v3 = vsel %vm838_vm0, %v839_v4, %v1580_v46  ;;  %v901_v5 = vshrl.u32 %v1289_v63, %v900_v14  ;;  %v922_v7 = vsel %vm920_vm2, %v910_v58, 2102212464  ;;  %v925_v8 = vsel %vm917_vm1, %v904_v51, %v907_v55 }
 0x254   : > { %v841_v61 = vadd.s32 %v840_v3, %v836_v0  ;;  %vm919_vm3 = vcmp.lt.s32.totalorder %v898_v47, 3  ;;  %v926_v9 = vsel %vm920_vm2, %v913_v59, 920167782  ;;  %v929_v62 = vsel %vm917_vm1, %v907_v55, %v910_v58 }
 0x255   : > { %vm918_vm4 = vcmp.lt.s32.totalorder %v898_v47, 2  ;;  %v921_v10 = vsel %vm917_vm1, %v901_v5, %v904_v51  ;;  %v927_v11 = vsel %vm919_vm3, %v910_v58, %v926_v9  ;;  %v930_v12 = vsel %vm920_vm2, %v916_v6, 1326507024 }
 0x256   : > { %v842_v13 = vadd.s32 536870912, %v841_v61  ;;  %v923_v15 = vsel %vm919_vm3, %v907_v55, %v922_v7  ;;  %v928_v16 = vsel %vm918_vm4, %v925_v8, %v927_v11  ;;  %v931_v17 = vsel %vm919_vm3, %v913_v59, %v930_v12 }
 0x257   : > { %v932_v18 = vsel %vm918_vm4, %v929_v62, %v931_v17  ;;  %v1590_v19 = vmul.u32.u64.low %v933_v39, %v928_v16  ;;  %v1591_v20 = vmul.u32.u64.high %v933_v39, %v928_v16, %v1590_v19  ;;  %v924_v23 = vsel %vm918_vm4, %v921_v10, %v923_v15 }
 0x258   : > { %v843_v21 = vshrl.u32 %v842_v13, 30  ;;  %v1593_v63 = vmul.u32.u64.low %v933_v39, %v932_v18  ;;  %v1594_v14 = vmul.u32.u64.high %v933_v39, %v932_v18, %v1593_v63  ;;  %v940_v26 = vmul.u32 %v933_v39, %v924_v23 }
 0x259   : > { %v943_v24 = vadd.s32 1, %v1591_v20  ;;  %v837_v40 = vadd.s32 %v1579_v43, %v1576_v42  ;;  %vm873_vm15 = vweird.f32 %v1555_v41  ;;  %vm977_vm3 = vweird.f32 %v1558_v44 }
 0x25a   : > { %v844_v1 = vshll.u32 %v843_v21, 30  ;;  %vm942_vm5 = vc.u32 %v1594_v14, %v1590_v19  ;;  %v941_v58 = vadd.s32 %v1590_v19, %v1594_v14  ;;  %v867_v10 = vsub.s32 4, %v843_v21 }
 0x25b   : > { %v944_v28 = vsel %vm942_vm5, %v943_v24, %v1591_v20  ;;  %vm1013_vm4 = vcmp.lt.s32.totalorder %v775_v22, 256 }
 0x25c   : > { %v845_v25 = vsub.s32 %v841_v61, %v844_v1  ;;  %v945_v30 = vadd.s32 %v944_v28, %v940_v26  ;;  %v868_v15 = vsel %vm783_vm8, %v867_v10, %v843_v21 }
 0x25d   : > { %v870_v45 = vsel %vm1605_vm9, 0, %v868_v15 }
 0x25e   : > { %v847_v29 = vsub.s32 0, %v845_v25  ;;  %v946_v32 = vadd.s32 536870912, %v945_v30  ;;  %v874_v63 = vadd.s32 3, %v870_v45 }
 0x260   : > { %v1110_v31 = vmin.u32 %v847_v29, %v845_v25  ;;  %v947_v34 = vshrl.u32 %v946_v32, 30  ;;  %v875_v1 = vand.u32 3, %v874_v63 }
 0x262   : > { %v849_v33 = vclz %v1110_v31  ;;  %v948_v36 = vshll.u32 %v947_v34, 30  ;;  %v971_v18 = vsub.s32 4, %v947_v34  ;;  %vm877_vm12 = vcmp.eq.s32.totalorder %v875_v1, 0 }
 0x263   : > { %vm880_vm13 = vcmp.eq.s32.totalorder %v875_v1, 2  ;;  %vm876_vm14 = vcmp.lt.s32.totalorder %v875_v1, 2 }
 0x264   : > { %v1111_v35 = vadd.s32 4294967294, %v849_v33  ;;  %v949_v38 = vsub.s32 %v945_v30, %v948_v36  ;;  %v972_v14 = vsel %vm887_vm10, %v971_v18, %v947_v34 }
 0x265   : > { %v974_v24 = vsel %vm886_vm11, 0, %v972_v14 }
 0x266   : > { %vm1112_vm6 = vcmp.lt.s32.totalorder %v1111_v35, 0  ;;  %v951_v47 = vsub.s32 0, %v949_v38  ;;  %v978_v28 = vadd.s32 3, %v974_v24 }
 0x267   : > { %v852_v37 = vsel %vm1112_vm6, 0, %v1111_v35  ;;  %v1295_v35 = vmov 1966171168  }
 0x268   : > { %v853_v46 = vsub.s32 32, %v852_v37  ;;  %v857_v39 = vsub.s32 4294967266, %v852_v37  ;;  %v854_v2 = vshll.u32 %v845_v25, %v852_v37  ;;  %v1114_v51 = vmin.u32 %v951_v47, %v949_v38 }
 0x269   : > { %v979_v50 = vand.u32 3, %v978_v28  ;;  %v997_v34 = vunpack.c.l.s4 %v1295_v35 }
 0x26a   : > { %v855_v48 = vshrl.u32 %v837_v40, %v853_v46  ;;  %v858_v49 = vadd.s32 127, %v857_v39  ;;  %v953_v54 = vclz %v1114_v51 }
 0x26b   : > { %vm984_vm0 = vcmp.eq.s32.totalorder %v979_v50, 2  ;;  %vm981_vm1 = vcmp.eq.s32.totalorder %v979_v50, 0  ;;  %vm980_vm2 = vcmp.lt.s32.totalorder %v979_v50, 2  ;;  %v998_v39 = vunpack.c.0.s8 %v997_v34 }
 0x26c   : > { %v856_v52 = vor.u32 %v855_v48, %v854_v2  ;;  %v859_v53 = vshll.u32 %v858_v49, 23  ;;  %v1115_v56 = vadd.s32 4294967294, %v953_v54 }
 0x26e   : > { %v860_v55 = vor.u32 4788187, %v859_v53  ;;  %v863_v60 = vcvt.s32.f32 %v856_v52  ;;  %vm1116_vm7 = vcmp.lt.s32.totalorder %v1115_v56, 0 }
 0x26f   : > { %v956_v4 = vsel %vm1116_vm7, 0, %v1115_v56 }
 0x270   : > { %v861_v57 = vand.u32 2147483647, %v860_v55  ;;  %v957_v42 = vsub.s32 32, %v956_v4  ;;  %v961_v43 = vsub.s32 4294967266, %v956_v4  ;;  %v958_v6 = vshll.u32 %v949_v38, %v956_v4 }
 0x272   : > { %v864_v0 = vmul.f32 %v863_v60, %v861_v57  ;;  %v959_v3 = vshrl.u32 %v941_v58, %v957_v42  ;;  %v962_v5 = vadd.s32 127, %v961_v43 }
 0x274   : > { %v865_v59 = vxor.u32 2147483648, %v864_v0  ;;  %v960_v9 = vor.u32 %v959_v3, %v958_v6  ;;  %v963_v62 = vshll.u32 %v962_v5, 23 }
 0x276   : > { %v866_v8 = vsel %vm783_vm8, %v865_v59, %v864_v0  ;;  %v964_v11 = vor.u32 4788187, %v963_v62  ;;  %v967_v13 = vcvt.s32.f32 %v960_v9 }
 0x277   : > { %v869_v61 = vsel %vm1605_vm9, %v1555_v41, %v866_v8  ;;  %v1001_v41 = vsub.s32 %v998_v39, %v1552_v27 }
 0x278   : > { %1218 = vcosq.f32 %v869_v61  ;;  %v965_v12 = vand.u32 2147483647, %v964_v11 }
 0x279   : > { %1220 = vsinq.f32 %v869_v61 }
 0x27a   : > { %v968_v16 = vmul.f32 %v967_v13, %v965_v12 }
 0x27c   : > { %v969_v17 = vxor.u32 2147483648, %v968_v16 }
 0x27e   : > { %v970_v19 = vsel %vm887_vm10, %v969_v17, %v968_v16 }
 0x27f   : > { %v973_v20 = vsel %vm886_vm11, %v1558_v44, %v970_v19 }
 0x280   : > { %1222 = vcosq.f32 %v973_v20 }
 0x281   : > { %1224 = vsinq.f32 %v973_v20 }
 0x285   : > { %v1219_v23 = vpop.eup %1218 }
 0x286   : > { %v1221_v21 = vpop.eup %1220  ;;  %v881_v26 = vxor.u32 2147483648, %v1219_v23 }
 0x287   : > { %v878_v25 = vxor.u32 2147483648, %v1221_v21 }
 0x288   : > { %v882_v30 = vsel %vm880_vm13, %v881_v26, %v1221_v21 }
 0x289   : > { %v879_v29 = vsel %vm877_vm12, %v1219_v23, %v878_v25 }
 0x28a   : > { %v883_v31 = vsel %vm876_vm14, %v879_v29, %v882_v30 }
 0x28b   : > { %v884_v37 = vsel %vm873_vm15, nan, %v883_v31 }
 0x28c   : > { %v989_v2 = vadd.f32 1.0, %v884_v37 }
 0x28d   : > { %v1223_v32 = vpop.eup %1222 }
 0x28e   : > { %v1225_v33 = vpop.eup %1224  ;;  %v985_v36 = vxor.u32 2147483648, %v1223_v32  ;;  %v991_v51 = vmul.f32 0.5, %v989_v2 }
 0x28f   : > { %v982_v38 = vxor.u32 2147483648, %v1225_v33 }
 0x290   : > { %v986_v40 = vsel %vm984_vm0, %v985_v36, %v1225_v33 }
 0x291   : > { %v983_v46 = vsel %vm981_vm1, %v1223_v32, %v982_v38 }
 0x292   : > { %v987_v47 = vsel %vm980_vm2, %v983_v46, %v986_v40 }
 0x293   : > { %v988_v48 = vsel %vm977_vm3, nan, %v987_v47 }
 0x294   : > { %v990_v49 = vadd.f32 1.0, %v988_v48 }
 0x296   : > { %v992_v52 = vmul.f32 0.5, %v990_v49 }
 0x298   : > { %v995_v53 = vcombine.low %v991_v51, %v992_v52 }
 0x29a   : > { %v1002_v54 = vrot.slane %v995_v53, %v1001_v41 }
 0x29c   : > { %v1009_v55 = vrot.slane %v1002_v54, %v1001_v41 }
 0x29e   : > { %1015 = vst.msk [vmem:[%s274_s22] sm:$0x3] %vm1013_vm4, %v1009_v55 }
 0x29f   : > { %1239 = shalt.err (!%p1236_p3)
}
 0x2a0   : > { %s1240_s17 = scalar_lea.hbm %s1029_s30, 32  ;;  %s1244_s19 = scalar_lea.hbm %s1663_s7, 128 }
 0x2a1   : > { %p1241_p4 = scmp.ne.s32.totalorder %s1029_s30, %s1240_s17  ;;  %p1245_p9 = scmp.lt.s32.totalorder %s1029_s30, %s1663_s7 }
 0x2a2   : > { %p1246_p10 = scmp.lt.s32.totalorder %s1244_s19, %s1240_s17 }
 0x2a3   : > { %p1242_p7 = pnand %p1241_p4, %p1375_p5 }
 0x2a4   : > { %p1247_p11 = por %p1246_p10, %p1245_p9 }
 0x2a5   : > { %p1243_p8 = pneg %p1242_p7 }
 0x2a7   : > { %p1248_p12 = pnand %p1247_p11, %p1243_p8 }
 0x2a9   : > { %1251 = shalt.err (!%p1248_p12)
}
 0x2aa   : > { %1163 = dma.vmem_to_hbm [thread:$0]  (%p1375_p5), %s1032_s23, 32, %s1029_s30, %s1017_s9  }
 0x2ab PF: > { %p1169_p13 = scmp.ge.s32.totalorder %s1286_s29, 2  ;;  %s1043_s22 = sand.u32 1, %s1274_s26  }
 0x2ac   : > { %s1044_s24 = scalar_lea.sflag [#allocation4], %s1043_s22 }
 0x2ad   : > { %p1166_p0 = pnand %p1169_p13, %p1379_p6 }
 0x2af   : > { %p1167_p1 = pneg %p1166_p0 }
 0x2b1   : > { %1269 = dma.done.wait (%p1167_p1), %s1044_s24, 32  }
 0x2b2   : > { %1271 = vsyncadd (%p1167_p1), %s1044_s24, 4294967264  ;;  %p19_p2 = scmp.ge.s32.totalorder %s1363_s8, 6   ;;  %s1668_s26 = smov %s1278_s27 }
 0x2b3   : > { %s1669_s27 = smov %s1282_s28  ;;  %s1670_s28 = smov %s1373_s11 }
 0x2b4   : > { %s1671_s29 = smov %s1363_s8  ;;  %21 = sbr.rel (!%p19_p2) target bundleno = 6 (0x6), region = 83 }
 0x2b9   :  { %1049 = vsyncpa [#allocation4], 1 }
 0x2ba   :  { %1051 = vsyncpa [#allocation4 + $0x1], 1 }

</bundles_post_ra>
